<compile_context>
chip_gen: v7x
topology: tpu7x:2x2x1
jax: 0.10.0
libtpu: 0.0.40
codegen_flags: <defaults>
</compile_context>

<pallas_src>
import jax
import jax.numpy as jnp
from jax.experimental import pallas as pl
from jax.experimental.pallas import tpu as pltpu


_SUBLANE = 8
_HIDDEN_LANE = 128


def _round_up(n, m):
    return ((n + m - 1) // m) * m


# ---------------------------------------------------------------------------
# Fused kernel: out = relu(x @ Wb + bb) @ Wl + bl   (intermediate never leaves
# VMEM/vregs; both matmuls hit the MXU with f32 accumulation)
# ---------------------------------------------------------------------------
def _fused_kernel(x_ref, wb_ref, bb_ref, wl_ref, bl_ref, o_ref):
    # x_ref : [TB, Fin]  bf16   wb_ref: [Fin, Hp] bf16   bb_ref: [1, Hp] bf16
    # wl_ref: [Hp,  C]   bf16   bl_ref: [1,  C]  bf16    o_ref : [TB, C] f32
    h = jnp.dot(x_ref[...], wb_ref[...], preferred_element_type=jnp.float32)
    h = jnp.maximum(h + bb_ref[...], 0.0)
    y = jnp.dot(h.astype(wl_ref.dtype), wl_ref[...],
                preferred_element_type=jnp.float32)
    o_ref[...] = (y + bl_ref[...]).astype(o_ref.dtype)


# ---------------------------------------------------------------------------
# Parameters
# ---------------------------------------------------------------------------
def make_params(in_features=32, last_shape=16, n_classes=8):
    """Deterministic synthetic parameters (no checkpoint).

    Weights are stored as [F_in, F_out] (transposed vs. PyTorch's [out, in])
    so the kernel is a plain y = x @ W + b matmul on the MXU.
    """
    k = jax.random.PRNGKey(42)
    k1, k2, k3, k4 = jax.random.split(k, 4)
    w_base = jax.random.normal(k1, (in_features, last_shape), jnp.float32) * 0.1
    b_base = jax.random.normal(k2, (last_shape,), jnp.float32) * 0.1
    w_last = jax.random.normal(k3, (last_shape, n_classes), jnp.float32) * 0.1
    b_last = jax.random.normal(k4, (n_classes,), jnp.float32) * 0.1
    return dict(w_base=w_base, b_base=b_base, w_last=w_last, b_last=b_last)


def prepare_kernel_params(params):
    """Cast weights to bf16 and pad ONLY the hidden dim to a lane multiple.

    Zero hidden columns of w_base + zero bias entries give relu(0)=0 in the
    padded lanes; zero rows of w_last make them contribute nothing, so the
    padding is exact.  Input-feature and class dims are left at their true
    sizes (they are the HBM-facing activation dims).
    """
    fin, h = params["w_base"].shape
    h2, c = params["w_last"].shape
    assert h == h2
    h_p = _round_up(h, _HIDDEN_LANE)
    bf = jnp.bfloat16

    def pad2(a, shape):
        return jnp.pad(a, [(0, s - d) for d, s in zip(a.shape, shape)])

    return dict(
        w_base=pad2(params["w_base"], (fin, h_p)).astype(bf),
        b_base=pad2(params["b_base"].reshape(1, h), (1, h_p)).astype(bf),
        w_last=pad2(params["w_last"], (h_p, c)).astype(bf),
        b_last=params["b_last"].reshape(1, c).astype(bf),
        dims=(fin, h, c, h_p),
    )


# ---------------------------------------------------------------------------
# Forward pass
# ---------------------------------------------------------------------------
def gen_model_forward(kparams, x, *, batch_tile=2048):
    """out = last(base(x)) with base = Linear+ReLU, last = Linear.

    x: [B, in_features] (bf16 preferred; f32 is cast).  Returns [B, n_classes]
    in f32.  No activation padding, no output slicing.
    """
    fin, hdim, c, h_p = kparams["dims"]
    wb, bb = kparams["w_base"], kparams["b_base"]
    wl, bl = kparams["w_last"], kparams["b_last"]

    if x.dtype != jnp.bfloat16:
        x = x.astype(jnp.bfloat16)

    B = x.shape[0]
    assert x.shape[1] == fin

    # Real (unpadded) flops / bytes for the scheduler.
    cost = pl.CostEstimate(
        flops=2 * B * (fin * hdim + hdim * c),
        transcendentals=0,
        bytes_accessed=(B * fin * 2                 # x (bf16)
                        + (fin * h_p + h_p * c) * 2  # weights (bf16)
                        + (h_p + c) * 2              # biases
                        + B * c * 4),                # out (f32)
    )

    out_shape = jax.ShapeDtypeStruct((B, c), jnp.float32)

    if B <= batch_tile:
        # ---- small batch: single block, no grid, no pipeline machinery ----
        return pl.pallas_call(
            _fused_kernel,
            out_shape=out_shape,
            in_specs=[pl.BlockSpec(memory_space=pltpu.MemorySpace.VMEM)] * 5,
            out_specs=pl.BlockSpec(memory_space=pltpu.MemorySpace.VMEM),
            cost_estimate=cost,
        )(x, wb, bb, wl, bl)

    # ---- large batch: tile the batch axis only; weights stay VMEM-resident.
    # Nudge the grid length to be even so v7x's 2 TCs split the "parallel"
    # axis cleanly (no-op for single-TC v5e/v6e).
    n_tiles = pl.cdiv(B, batch_tile)
    if n_tiles % 2 == 1:
        n_tiles += 1
    tb = _round_up(pl.cdiv(B, n_tiles), _SUBLANE)
    grid = (pl.cdiv(B, tb),)  # last block may be partial -> masked tail

    return pl.pallas_call(
        _fused_kernel,
        out_shape=out_shape,
        grid=grid,
        in_specs=[
            pl.BlockSpec((tb, fin), lambda i: (i, 0)),   # x: true feature dim
            pl.BlockSpec((fin, h_p), lambda i: (0, 0)),  # weights: resident
            pl.BlockSpec((1, h_p), lambda i: (0, 0)),
            pl.BlockSpec((h_p, c), lambda i: (0, 0)),
            pl.BlockSpec((1, c), lambda i: (0, 0)),
        ],
        out_specs=pl.BlockSpec((tb, c), lambda i: (i, 0)),  # true class dim
        compiler_params=pltpu.CompilerParams(
            dimension_semantics=("parallel",)),
        cost_estimate=cost,
    )(x, wb, bb, wl, bl)


# ---------------------------------------------------------------------------
# Pure-JAX reference (same math / same bf16 casts, f32 accumulation)
# ---------------------------------------------------------------------------
def reference_forward(kparams, x_bf16):
    hp = jax.lax.Precision.HIGHEST
    xf = x_bf16.astype(jnp.float32)
    wb = kparams["w_base"].astype(jnp.float32)
    bb = kparams["b_base"].astype(jnp.float32)
    wl = kparams["w_last"].astype(jnp.float32)
    bl = kparams["b_last"].astype(jnp.float32)
    h = jnp.maximum(jnp.dot(xf, wb, precision=hp) + bb, 0.0)
    h = h.astype(jnp.bfloat16).astype(jnp.float32)   # matches in-kernel cast
    return jnp.dot(h, wl, precision=hp) + bl


if __name__ == "__main__":
    in_features = 32   # input feature dim consumed by the base module
    last_shape = 16    # output dim of base == input dim of `last`
    n_classes = 8

    params = make_params(in_features, last_shape, n_classes)
    kparams = prepare_kernel_params(params)

    # --- small-batch path (no grid) ---
    batch = 2
    x_small = jax.random.normal(jax.random.PRNGKey(0),
                                (batch, in_features), jnp.float32
                                ).astype(jnp.bfloat16)
    out_small = jax.block_until_ready(gen_model_forward(kparams, x_small))
    ref_small = reference_forward(kparams, x_small)
    assert out_small.shape == (batch, n_classes)
    assert jnp.allclose(out_small, ref_small, atol=1e-3, rtol=1e-3)

    # --- large-batch path (batch-tiled, parallel grid, masked tail block) ---
    big_batch = 2500   # not a multiple of the tile -> exercises the tail mask
    x_big = jax.random.normal(jax.random.PRNGKey(1),
                              (big_batch, in_features), jnp.float32
                              ).astype(jnp.bfloat16)
    out_big = jax.block_until_ready(gen_model_forward(kparams, x_big))
    ref_big = reference_forward(kparams, x_big)
    assert out_big.shape == (big_batch, n_classes)
    assert jnp.allclose(out_big, ref_big, atol=1e-3, rtol=1e-3)

    print("KERNEL_OK")
</pallas_src>

<mosaic_0001>
module attributes {stable_mosaic.version = 11 : i64} {
  func.func @_fused_kernel(%arg0: memref<2x32xbf16, #tpu.memory_space<vmem>>, %arg1: memref<32x128xbf16, #tpu.memory_space<vmem>>, %arg2: memref<1x128xbf16, #tpu.memory_space<vmem>>, %arg3: memref<128x8xbf16, #tpu.memory_space<vmem>>, %arg4: memref<1x8xbf16, #tpu.memory_space<vmem>>, %arg5: memref<2x8xf32, #tpu.memory_space<vmem>>) attributes {dimension_semantics = [], scalar_prefetch = 0 : i64, scratch_operands = 0 : i64, tpu.core_type = #tpu.core_type<tc>} {
    %c0 = arith.constant 0 : index
    %c0_0 = arith.constant 0 : index
    %0 = vector.load %arg0[%c0, %c0_0] : memref<2x32xbf16, #tpu.memory_space<vmem>>, vector<2x32xbf16>
    %c0_1 = arith.constant 0 : index
    %c0_2 = arith.constant 0 : index
    %1 = vector.load %arg1[%c0_1, %c0_2] : memref<32x128xbf16, #tpu.memory_space<vmem>>, vector<32x128xbf16>
    %cst = arith.constant dense<0.000000e+00> : vector<2x128xf32>
    %2 = tpu.matmul %0, %1, %cst {dimension_numbers = #tpu.dot_dimension_numbers<[1], [0], [0], [1], [0, 0, 1, 1], [], []>} : vector<2x32xbf16>, vector<32x128xbf16>, vector<2x128xf32> -> vector<2x128xf32>
    %c0_3 = arith.constant 0 : index
    %c0_4 = arith.constant 0 : index
    %3 = vector.load %arg2[%c0_3, %c0_4] : memref<1x128xbf16, #tpu.memory_space<vmem>>, vector<1x128xbf16>
    %4 = arith.extf %3 : vector<1x128xbf16> to vector<1x128xf32>
    %5 = vector.broadcast %4 : vector<1x128xf32> to vector<2x128xf32>
    %6 = arith.addf %2, %5 : vector<2x128xf32>
    %cst_5 = arith.constant 0.000000e+00 : f32
    %7 = vector.broadcast %cst_5 : f32 to vector<2x128xf32>
    %8 = arith.maximumf %6, %7 : vector<2x128xf32>
    %9 = arith.truncf %8 : vector<2x128xf32> to vector<2x128xbf16>
    %c0_6 = arith.constant 0 : index
    %c0_7 = arith.constant 0 : index
    %10 = vector.load %arg3[%c0_6, %c0_7] : memref<128x8xbf16, #tpu.memory_space<vmem>>, vector<128x8xbf16>
    %cst_8 = arith.constant dense<0.000000e+00> : vector<2x8xf32>
    %11 = tpu.matmul %9, %10, %cst_8 {dimension_numbers = #tpu.dot_dimension_numbers<[1], [0], [0], [1], [0, 0, 1, 1], [], []>} : vector<2x128xbf16>, vector<128x8xbf16>, vector<2x8xf32> -> vector<2x8xf32>
    %c0_9 = arith.constant 0 : index
    %c0_10 = arith.constant 0 : index
    %12 = vector.load %arg4[%c0_9, %c0_10] : memref<1x8xbf16, #tpu.memory_space<vmem>>, vector<1x8xbf16>
    %13 = arith.extf %12 : vector<1x8xbf16> to vector<1x8xf32>
    %14 = vector.broadcast %13 : vector<1x8xf32> to vector<2x8xf32>
    %15 = arith.addf %11, %14 : vector<2x8xf32>
    %c0_11 = arith.constant 0 : index
    %c0_12 = arith.constant 0 : index
    %16 = vector.load %arg5[%c0_11, %c0_12] : memref<2x8xf32, #tpu.memory_space<vmem>>, vector<2x8xf32>
    tpu.vector_store %arg5[%c0_11, %c0_12], %15 {strides = array<i32>} : memref<2x8xf32, #tpu.memory_space<vmem>>, vector<2x8xf32>,
    return
  }
}

</mosaic_0001>

<bundles_post_ra>
// kernel: tpu_custom_call.1
= control target key start
LH: loop header
LB: loop body
LE: loop exit
PB: predicated region body
PF: predicated region fallthrough
CT: control target
= control target key end

     0   :  { %v305_v1 = vmov 0.0   ;;  %vm306_vm0 = vmmov 0   ;;  %vm45_vm1 = vcmask 261120   ;;  %s389_s0 = inlined_call_operand.vmem [shape: bf16[2,32], index: 0, kind: input, shape index: {}]   ;;  %s390_s1 = inlined_call_operand.vmem [shape: bf16[32,128], index: 1, kind: input, shape index: {}]   ;;  %s391_s2 = inlined_call_operand.vmem [shape: bf16[1,128], index: 2, kind: input, shape index: {}]   ;;  %s392_s3 = inlined_call_operand.vmem [shape: bf16[128,8], index: 3, kind: input, shape index: {}]   ;;  %s393_s4 = inlined_call_operand.vmem [shape: bf16[1,8], index: 4, kind: input, shape index: {}]   ;;  %s394_s5 = inlined_call_operand.hbm [shape: f32[2,8], index: 5, kind: output, shape index: {}]  }
   0x1   :  { %v271_v0 = vld [vmem:[%s390_s1] sm:$0xff]   ;;  %240 = vmatprep.subr.bf16.mxu0 %v305_v1  ;;  %248 = vmatprep.subr.bf16.mxu1 %v305_v1  ;;  %v272_v2 = vld [vmem:[%s390_s1 + $0x8] sm:$0xff]   ;;  %v275_v6 = vld [vmem:[%s392_s3 + $0x10] sm:$0xff]  }
   0x2   :  { %241 = vmatpush3.bf16.msra.mxu0 %v271_v0  ;;  %244 = vmatprep.mubr.msk.bf16.mxu0 %vm306_vm0, %v305_v1  ;;  %v273_v3 = vld [vmem:[%s392_s3] sm:$0xff]   ;;  %v274_v4 = vld [vmem:[%s392_s3 + $0x8] sm:$0xff]  }
   0x3   :  { %242 = vmatprep.subr.bf16.mxu0 %v305_v1  ;;  %264 = vmatprep.mubr.msk.bf16.mxu1 %vm306_vm0, %v305_v1  ;;  %v22_v5 = vld [vmem:[%s389_s0] sm:$0x1] }
   0x4   :  { %249 = vmatpush3.bf16.msra.mxu1 %v273_v3 }
   0x5   :  { %250 = vmatprep.subr.bf16.mxu1 %v305_v1 }
   0x6   :  { %243 = vmatpush3.bf16.msra.mxu0 %v272_v2 }
   0x8   :  { %251 = vmatpush3.bf16.msra.mxu1 %v274_v4 }
   0x9   :  { %245 = vmatmul.mubr.msk.bf16.vlgmr.msra.gmra.mrb[0].mxu0 %vm45_vm1, %v22_v5  ;;  %252 = vmatprep.subr.bf16.mxu1 %v305_v1 }
   0xa   :  { %10 = vsyncpa [#allocation3], 0  ;;  %v276_v7 = vld [vmem:[%s392_s3 + $0x18] sm:$0xff]   ;;  %v277_v8 = vld [vmem:[%s392_s3 + $0x20] sm:$0xff]   ;;  %v29_v12 = vlaneseq  ;;  %s307_s16 = smov [#allocation2]   ;;  %vm201_vm2 = vcmask 58368  }
   0xb   :  { %v278_v9 = vld [vmem:[%s392_s3 + $0x28] sm:$0xff]   ;;  %v279_v10 = vld [vmem:[%s392_s3 + $0x30] sm:$0xff]   ;;  %v280_v11 = vld [vmem:[%s392_s3 + $0x38] sm:$0xff]   ;;  %s209_s17 = sshll.u32 %s307_s16, 4  ;;  %s210_s17 = int_to_ptr.vmem [resolvable:$true] %s209_s17 }
   0xc   :  { %253 = vmatpush3.bf16.msra.mxu1 %v275_v6  ;;  %v30_v13 = vshrl.u32 %v29_v12, 7  ;;  %v27_v14 = vld [vmem:[%s391_s2] sm:$0x1]  ;;  %s281_s2 = scalar_lea.vmem %s210_s17, 32  ;;  %p286_p1 = scmp.lt.s32.totalorder %s210_s17, %s210_s17 }
   0xd   :  { %254 = vmatprep.subr.bf16.mxu1 %v305_v1  ;;  %v28_v15 = vunpack.c.l.bf16 %v27_v14  ;;  %v107_v25 = vld [vmem:[%s393_s4] sm:$0x1]  ;;  %p282_p0 = scmp.ne.s32.totalorder %s210_s17, %s281_s2  ;;  %p287_p2 = scmp.lt.s32.totalorder %s281_s2, %s281_s2 }
   0xe   :  { %v31_v16 = vsub.s32 0, %v30_v13  ;;  %v108_v26 = vunpack.c.l.bf16 %v107_v25 }
   0xf   :  { %p288_p3 = por %p287_p2, %p286_p1 }
  0x10   :  { %255 = vmatpush3.bf16.msra.mxu1 %v276_v7  ;;  %v32_v17 = vrot.slane %v28_v15, %v31_v16  ;;  %v112_v27 = vrot.slane %v108_v26, %v31_v16 }
  0x11   :  { %256 = vmatprep.subr.bf16.mxu1 %v305_v1  ;;  %p289_p4 = pnand %p288_p3, %p282_p0 }
  0x14   :  { %257 = vmatpush3.bf16.msra.mxu1 %v277_v8 }
  0x15   :  { %258 = vmatprep.subr.bf16.mxu1 %v305_v1 }
  0x18   :  { %259 = vmatpush3.bf16.msra.mxu1 %v278_v9 }
  0x19   :  { %260 = vmatprep.subr.bf16.mxu1 %v305_v1 }
  0x1c   :  { %261 = vmatpush3.bf16.msra.mxu1 %v279_v10 }
  0x1d   :  { %262 = vmatprep.subr.bf16.mxu1 %v305_v1 }
  0x20   :  { %263 = vmatpush3.bf16.msra.mxu1 %v280_v11 }
  0xdc   :  { %v83_v18 = vpop.f32.mrb[0].mxu0 }
  0xdd   :  { %v84_v19 = vadd.f32 %v83_v18, %v32_v17  ;;  %v246_v20 = vpop.f32.mrb[1].mxu0 }
  0xde   :  { %v86_v21 = vpop.f32.mrb[2].mxu0 }
  0xdf   :  { %v89_v22 = vmax.f32 %v84_v19, 0.0  ;;  %v247_v23 = vpop.f32.mrb[3].mxu0 }
  0xe1   :  { %v90_v24 = vpack.c.bf16 %v89_v22, %v89_v22 }
  0xe3   :  { %265 = vmatmul.mubr.bf16.vlgmr.msra.gmra.mrb[0].mxu1 %v90_v24 }
 0x1b6   :  { %v195_v28 = vpop.f32.mrb[0].mxu1 }
 0x1b7   :  { %v196_v29 = vadd.f32 %v195_v28, %v112_v27  ;;  %v266_v30 = vpop.f32.mrb[1].mxu1 }
 0x1b8   :  { %v198_v31 = vpop.f32.mrb[2].mxu1 }
 0x1b9   :  { %v267_v32 = vpop.f32.mrb[3].mxu1  ;;  %202 = vst.msk [vmem:[#allocation2] sm:$0x3] %vm201_vm2, %v196_v29 }
 0x1ba   :  { %292 = shalt.err (!%p289_p4)
}
 0x1bb   :  { %s293_s19 = scalar_lea.hbm %s394_s5, 32 }
 0x1bc   :  { %p294_p5 = scmp.ne.s32.totalorder %s394_s5, %s293_s19  ;;  %p297_p6 = scmp.lt.u32.totalorder %s293_s19, %s394_s5 }
 0x1be   :  { %p299_p7 = pnand %p297_p6, %p294_p5 }
 0x1c0   :  { %302 = shalt.err (!%p299_p7)
}
 0x1c1   :  { %212 = dma.vmem_to_hbm [thread:$0]  %s210_s17, 32, %s394_s5, [#allocation3]  }
 0x1c2   :  { %303 = dma.done.wait [#allocation3], 32  }
 0x1c3   :  { %304 = vsyncadd [#allocation3], 4294967264 }
 0x1c4   :  { %216 = vsyncpa [#allocation3], 1 }

</bundles_post_ra>
